<compile_context>
chip_gen: v7x
topology: tpu7x:2x2x1
jax: 0.10.0
libtpu: 0.0.40
codegen_flags: <defaults>
</compile_context>

<pallas_src>
import functools

import jax
import jax.numpy as jnp
from jax import lax
from jax.experimental import pallas as pl
from jax.experimental.pallas import tpu as pltpu


def _round_up(v, m):
    return ((v + m - 1) // m) * m


def _fused_linear_segmax_kernel(offs_ref, x_ref, w_ref, b_ref, o_ref,
                                acc_ref, part_ref,
                                *, tm, n_tiles, tiles_per_core, num_graphs):
    c = pl.program_id(0)          # core / parallel axis
    i = pl.program_id(1)          # row-tile / reduction axis

    @pl.when(i == 0)
    def _init():
        # Per-core accumulator init (re-runs when the inner axis restarts).
        acc_ref[...] = jnp.full(acc_ref.shape, -jnp.inf, dtype=acc_ref.dtype)

    # Linear: (TM, in_c) contracted with (out_c_pad, in_c) on dim 1 of both
    # -> (TM, out_c_pad). PyTorch weight layout consumed directly; f32 accumulation.
    y = lax.dot_general(
        x_ref[...], w_ref[...],
        dimension_numbers=(((1,), (1,)), ((), ())),
        preferred_element_type=jnp.float32,
    )

    # Row ids of this tile. The clamp mirrors the x index_map (the second core may
    # re-process the last tile when n_tiles is odd; duplicates are harmless for max).
    tile_idx = jnp.minimum(c * tiles_per_core + i, n_tiles - 1)
    tile_start = tile_idx * tm
    tile_end = tile_start + tm
    row_ids = tile_start + lax.broadcasted_iota(jnp.int32, (tm, 1), 0)

    # Per-tile partial maxima: gated per-graph writes into a tiny VMEM scratch,
    # then ONE full-block maximum into the resident accumulator.
    part_ref[...] = jnp.full(part_ref.shape, -jnp.inf, dtype=part_ref.dtype)
    for g in range(num_graphs):
        lo = offs_ref[g]
        hi = offs_ref[g + 1]

        # Range gating: skip graphs whose (sorted) row range misses this tile.
        @pl.when(jnp.logical_and(hi > tile_start, lo < tile_end))
        def _segment_max(g=g, lo=lo, hi=hi):
            mask = jnp.logical_and(row_ids >= lo, row_ids < hi)    # (TM, 1)
            contrib = jnp.where(mask, y, -jnp.inf)                 # (TM, out_c_pad)
            part_ref[g:g + 1, :] = contrib.max(axis=0, keepdims=True)

    acc_ref[...] = jnp.maximum(acc_ref[...], part_ref[...])

    @pl.when(i == pl.num_programs(1) - 1)
    def _finalize():
        # Bias hoisted out of the streamed path: max(y) + b == max(y + b);
        # -inf + b = -inf keeps empty-graph rows at -inf.
        o_ref[...] = (acc_ref[...] + b_ref[...]).astype(o_ref.dtype)


def global_sa_module_nocoords_forward(x, pos, batch, weight, bias, num_graphs,
                                      *, tm=4096):
    """Pallas equivalent of GlobalSAModule_NoCoords.forward (nn = Linear).

    x:      (N, in_c)      node features
    pos:    (N, 3)         node positions (only dtype used, as in the module)
    batch:  (N,)           SORTED int graph id per node, values in [0, num_graphs)
    weight: (out_c, in_c)  nn.Linear weight (PyTorch layout, NOT transposed)
    bias:   (out_c,)       nn.Linear bias
    num_graphs: static number of graphs (== batch.max() + 1 in PyTorch)
    """
    n, in_c = x.shape
    out_c = weight.shape[0]

    # Lane-dense output channels; accumulator rows padded to a sublane multiple.
    out_c_pad = _round_up(out_c, 128)
    g_pad = _round_up(num_graphs, 8)
    if out_c_pad != out_c:
        weight = jnp.pad(weight, ((0, out_c_pad - out_c), (0, 0)))
        bias = jnp.pad(bias, (0, out_c_pad - out_c))
    b2d = bias.reshape(1, out_c_pad).astype(jnp.float32)

    # Sorted-batch precondition: rows of graph g are [offsets[g], offsets[g+1]).
    # Computed once here, scalar-prefetched into SMEM (no per-tile batch DMA stream).
    offsets = jnp.searchsorted(
        batch.astype(jnp.int32),
        jnp.arange(num_graphs + 1, dtype=jnp.int32)).astype(jnp.int32)

    # Row tile: multiple of 8, capped at `tm`, never larger than needed for small N.
    tm_eff = min(max(8, (tm // 8) * 8), _round_up(n, 8))
    n_tiles = pl.cdiv(n, tm_eff)

    # Two-TensorCore split (v7x). Each core owns its output slice / accumulator;
    # the wrapper combines with jnp.maximum. Sequential (and still correct) on v5e/v6e.
    num_cores = 2 if n_tiles >= 2 else 1
    tiles_per_core = pl.cdiv(n_tiles, num_cores)

    def x_map(c, i, offs):
        # Clamp so the second core's overhang re-reads the last real tile
        # (duplicate work is idempotent under max).
        return (jnp.minimum(c * tiles_per_core + i, n_tiles - 1), 0)

    kernel = functools.partial(
        _fused_linear_segmax_kernel,
        tm=tm_eff, n_tiles=n_tiles, tiles_per_core=tiles_per_core,
        num_graphs=num_graphs)

    bytes_accessed = (x.size * x.dtype.itemsize
                      + weight.size * weight.dtype.itemsize
                      + (num_graphs + 1) * 4
                      + num_cores * g_pad * out_c_pad * x.dtype.itemsize)

    out = pl.pallas_call(
        kernel,
        out_shape=jax.ShapeDtypeStruct((num_cores, g_pad, out_c_pad), x.dtype),
        grid_spec=pltpu.PrefetchScalarGridSpec(
            num_scalar_prefetch=1,
            grid=(num_cores, tiles_per_core),
            in_specs=[
                pl.BlockSpec((tm_eff, in_c), x_map),                      # x: streamed
                pl.BlockSpec((out_c_pad, in_c), lambda c, i, offs: (0, 0)),  # weight: resident
                pl.BlockSpec((1, out_c_pad), lambda c, i, offs: (0, 0)),     # bias:   resident
            ],
            out_specs=pl.BlockSpec((None, g_pad, out_c_pad),
                                   lambda c, i, offs: (c, 0, 0)),
            scratch_shapes=[pltpu.VMEM((g_pad, out_c_pad), jnp.float32),   # acc
                            pltpu.VMEM((g_pad, out_c_pad), jnp.float32)],  # per-tile partial
        ),
        compiler_params=pltpu.CompilerParams(
            # Pooled max is accumulated across row tiles -> inner axis is a reduction;
            # the leading core axis is independent (per-core accumulator + output slice).
            dimension_semantics=("parallel", "arbitrary"),
            vmem_limit_bytes=32 * 1024 * 1024,
        ),
        cost_estimate=pl.CostEstimate(
            flops=2 * n * in_c * out_c_pad,
            transcendentals=0,
            bytes_accessed=bytes_accessed,
        ),
    )(offsets, x, weight, b2d)

    # Combine the per-core partial maxima, strip padding.
    pooled = jnp.max(out, axis=0)[:num_graphs, :out_c]

    # Constant-fill outputs of the module, built in plain JAX (no kernel needed).
    pos_out = jnp.zeros((num_graphs, 3), dtype=pos.dtype)
    batch_out = jnp.arange(num_graphs, dtype=jnp.int32)
    return pooled, pos_out, batch_out


if __name__ == "__main__":
    key = jax.random.PRNGKey(0)
    k_x, k_w, k_b, k_p = jax.random.split(key, 4)

    NUM_GRAPHS = 3
    GRAPH_SIZES = (70, 60, 70)            # ragged, non-empty graphs; N = 200
    N = sum(GRAPH_SIZES)
    IN_C, OUT_C = 32, 64

    # Deterministic nn.Linear(IN_C, OUT_C)-style parameters.
    bound = float(1.0 / (IN_C ** 0.5))
    weight = jax.random.uniform(k_w, (OUT_C, IN_C), jnp.float32, -bound, bound)
    bias = jax.random.uniform(k_b, (OUT_C,), jnp.float32, -bound, bound)

    x = jax.random.normal(k_x, (N, IN_C), jnp.float32)
    pos = jax.random.normal(k_p, (N, 3), jnp.float32)
    batch = jnp.concatenate([jnp.full((s,), g, dtype=jnp.int32)
                             for g, s in enumerate(GRAPH_SIZES)])

    # tm=64 here only to exercise multi-tile + two-core paths at this tiny N;
    # production default is tm=4096.
    out_x, out_pos, out_batch = global_sa_module_nocoords_forward(
        x, pos, batch, weight, bias, NUM_GRAPHS, tm=64)
    out_x, out_pos, out_batch = jax.block_until_ready((out_x, out_pos, out_batch))

    # Pure-JAX reference for the module's forward.
    y_ref = x @ weight.T + bias
    pooled_ref = jax.ops.segment_max(y_ref, batch, num_segments=NUM_GRAPHS)

    assert out_x.shape == (NUM_GRAPHS, OUT_C)
    assert jnp.allclose(out_x, pooled_ref, atol=1e-5, rtol=1e-5)
    assert out_pos.shape == (NUM_GRAPHS, 3) and bool(jnp.all(out_pos == 0.0))
    assert bool(jnp.array_equal(out_batch, jnp.arange(NUM_GRAPHS, dtype=jnp.int32)))

    print("KERNEL_OK")
</pallas_src>

<mosaic_0001>
module attributes {stable_mosaic.version = 11 : i64} {
  func.func @_fused_linear_segmax_kernel(%arg0: i32, %arg1: i32, %arg2: memref<4xi32, #tpu.memory_space<smem>>, %arg3: memref<64x32xf32, #tpu.memory_space<vmem>>, %arg4: memref<128x32xf32, #tpu.memory_space<vmem>>, %arg5: memref<1x128xf32, #tpu.memory_space<vmem>>, %arg6: memref<1x8x128xf32, #tpu.memory_space<vmem>>, %arg7: memref<8x128xf32, #tpu.memory_space<vmem>>, %arg8: memref<8x128xf32, #tpu.memory_space<vmem>>) attributes {dimension_semantics = [#tpu.dimension_semantics<parallel>, #tpu.dimension_semantics<arbitrary>], iteration_bounds = array<i64: 2, 2>, scalar_prefetch = 1 : i64, scratch_operands = 2 : i64, tpu.core_type = #tpu.core_type<tc>, window_params = [{transform_indices = @transform_0, window_bounds = array<i64: 64, 32>}, {pipeline_mode = #tpu.pipeline_mode<synchronous>, transform_indices = @transform_1, window_bounds = array<i64: 128, 32>}, {pipeline_mode = #tpu.pipeline_mode<synchronous>, transform_indices = @transform_2, window_bounds = array<i64: 1, 128>}, {transform_indices = @transform_3, window_bounds = array<i64: 1, 8, 128>}]} {
    %c0_i32 = arith.constant 0 : i32
    %0 = arith.cmpi eq, %arg1, %c0_i32 : i32
    %1 = arith.extui %0 : i1 to i32
    %c0_i32_0 = arith.constant 0 : i32
    %2 = arith.cmpi ne, %1, %c0_i32_0 : i32
    scf.if %2 {
      %cst_21 = arith.constant 0xFF800000 : f32
      %44 = vector.broadcast %cst_21 : f32 to vector<8x128xf32>
      %c0_22 = arith.constant 0 : index
      %c0_23 = arith.constant 0 : index
      %45 = vector.load %arg7[%c0_22, %c0_23] : memref<8x128xf32, #tpu.memory_space<vmem>>, vector<8x128xf32>
      tpu.vector_store %arg7[%c0_22, %c0_23], %44 {strides = array<i32>} : memref<8x128xf32, #tpu.memory_space<vmem>>, vector<8x128xf32>,
    } else {
    }
    %c0 = arith.constant 0 : index
    %c0_1 = arith.constant 0 : index
    %3 = vector.load %arg3[%c0, %c0_1] : memref<64x32xf32, #tpu.memory_space<vmem>>, vector<64x32xf32>
    %c0_2 = arith.constant 0 : index
    %c0_3 = arith.constant 0 : index
    %4 = vector.load %arg4[%c0_2, %c0_3] : memref<128x32xf32, #tpu.memory_space<vmem>>, vector<128x32xf32>
    %cst = arith.constant dense<0.000000e+00> : vector<64x128xf32>
    %5 = tpu.matmul %3, %4, %cst {dimension_numbers = #tpu.dot_dimension_numbers<[1], [1], [0], [0], [0, 0, 1, 0], [], []>} : vector<64x32xf32>, vector<128x32xf32>, vector<64x128xf32> -> vector<64x128xf32>
    %c2_i32 = arith.constant 2 : i32
    %6 = arith.muli %arg0, %c2_i32 : i32
    %7 = arith.addi %6, %arg1 : i32
    %c3_i32 = arith.constant 3 : i32
    %8 = arith.minsi %7, %c3_i32 : i32
    %c64_i32 = arith.constant 64 : i32
    %9 = arith.muli %8, %c64_i32 : i32
    %c64_i32_4 = arith.constant 64 : i32
    %10 = arith.addi %9, %c64_i32_4 : i32
    %11 = tpu.iota {dimensions = array<i32: 0>} : vector<64x1xi32>
    %12 = vector.broadcast %9 : i32 to vector<64x1xi32>
    %13 = arith.addi %12, %11 : vector<64x1xi32>
    %cst_5 = arith.constant 0xFF800000 : f32
    %14 = vector.broadcast %cst_5 : f32 to vector<8x128xf32>
    %c0_6 = arith.constant 0 : index
    %c0_7 = arith.constant 0 : index
    %15 = vector.load %arg8[%c0_6, %c0_7] : memref<8x128xf32, #tpu.memory_space<vmem>>, vector<8x128xf32>
    tpu.vector_store %arg8[%c0_6, %c0_7], %14 {strides = array<i32>} : memref<8x128xf32, #tpu.memory_space<vmem>>, vector<8x128xf32>,
    %c0_8 = arith.constant 0 : index
    %16 = memref.load %arg2[%c0_8] : memref<4xi32, #tpu.memory_space<smem>>
    %c1 = arith.constant 1 : index
    %17 = memref.load %arg2[%c1] : memref<4xi32, #tpu.memory_space<smem>>
    %18 = arith.cmpi sgt, %17, %9 : i32
    %19 = arith.cmpi slt, %16, %10 : i32
    %20 = arith.andi %18, %19 : i1
    %21 = arith.extui %20 : i1 to i32
    %c0_i32_9 = arith.constant 0 : i32
    %22 = arith.cmpi ne, %21, %c0_i32_9 : i32
    scf.if %22 {
      %44 = vector.broadcast %16 : i32 to vector<64x1xi32>
      %45 = arith.cmpi sge, %13, %44 : vector<64x1xi32>
      %46 = vector.broadcast %17 : i32 to vector<64x1xi32>
      %47 = arith.cmpi slt, %13, %46 : vector<64x1xi32>
      %48 = arith.andi %45, %47 : vector<64x1xi1>
      %cst_21 = arith.constant 0xFF800000 : f32
      %49 = vector.shape_cast %48 : vector<64x1xi1> to vector<64x1xi1>
      %50 = vector.broadcast %49 : vector<64x1xi1> to vector<64x128xi1>
      %51 = vector.broadcast %cst_21 : f32 to vector<64x128xf32>
      %52 = arith.select %50, %5, %51 : vector<64x128xi1>, vector<64x128xf32>
      %cst_22 = arith.constant dense<0xFF800000> : vector<128xf32>
      %53 = vector.multi_reduction <maximumf>, %52, %cst_22 [0] : vector<64x128xf32> to vector<128xf32>
      %54 = vector.shape_cast %53 : vector<128xf32> to vector<1x128xf32>
      %c0_23 = arith.constant 0 : index
      %c0_24 = arith.constant 0 : index
      %55 = vector.load %arg8[%c0_23, %c0_24] : memref<8x128xf32, #tpu.memory_space<vmem>>, vector<1x128xf32>
      tpu.vector_store %arg8[%c0_23, %c0_24], %54 {strides = array<i32>} : memref<8x128xf32, #tpu.memory_space<vmem>>, vector<1x128xf32>,
    } else {
    }
    %c1_10 = arith.constant 1 : index
    %23 = memref.load %arg2[%c1_10] : memref<4xi32, #tpu.memory_space<smem>>
    %c2 = arith.constant 2 : index
    %24 = memref.load %arg2[%c2] : memref<4xi32, #tpu.memory_space<smem>>
    %25 = arith.cmpi sgt, %24, %9 : i32
    %26 = arith.cmpi slt, %23, %10 : i32
    %27 = arith.andi %25, %26 : i1
    %28 = arith.extui %27 : i1 to i32
    %c0_i32_11 = arith.constant 0 : i32
    %29 = arith.cmpi ne, %28, %c0_i32_11 : i32
    scf.if %29 {
      %44 = vector.broadcast %23 : i32 to vector<64x1xi32>
      %45 = arith.cmpi sge, %13, %44 : vector<64x1xi32>
      %46 = vector.broadcast %24 : i32 to vector<64x1xi32>
      %47 = arith.cmpi slt, %13, %46 : vector<64x1xi32>
      %48 = arith.andi %45, %47 : vector<64x1xi1>
      %cst_21 = arith.constant 0xFF800000 : f32
      %49 = vector.shape_cast %48 : vector<64x1xi1> to vector<64x1xi1>
      %50 = vector.broadcast %49 : vector<64x1xi1> to vector<64x128xi1>
      %51 = vector.broadcast %cst_21 : f32 to vector<64x128xf32>
      %52 = arith.select %50, %5, %51 : vector<64x128xi1>, vector<64x128xf32>
      %cst_22 = arith.constant dense<0xFF800000> : vector<128xf32>
      %53 = vector.multi_reduction <maximumf>, %52, %cst_22 [0] : vector<64x128xf32> to vector<128xf32>
      %54 = vector.shape_cast %53 : vector<128xf32> to vector<1x128xf32>
      %c1_23 = arith.constant 1 : index
      %c0_24 = arith.constant 0 : index
      %55 = vector.load %arg8[%c1_23, %c0_24] : memref<8x128xf32, #tpu.memory_space<vmem>>, vector<1x128xf32>
      tpu.vector_store %arg8[%c1_23, %c0_24], %54 {strides = array<i32>} : memref<8x128xf32, #tpu.memory_space<vmem>>, vector<1x128xf32>,
    } else {
    }
    %c2_12 = arith.constant 2 : index
    %30 = memref.load %arg2[%c2_12] : memref<4xi32, #tpu.memory_space<smem>>
    %c3 = arith.constant 3 : index
    %31 = memref.load %arg2[%c3] : memref<4xi32, #tpu.memory_space<smem>>
    %32 = arith.cmpi sgt, %31, %9 : i32
    %33 = arith.cmpi slt, %30, %10 : i32
    %34 = arith.andi %32, %33 : i1
    %35 = arith.extui %34 : i1 to i32
    %c0_i32_13 = arith.constant 0 : i32
    %36 = arith.cmpi ne, %35, %c0_i32_13 : i32
    scf.if %36 {
      %44 = vector.broadcast %30 : i32 to vector<64x1xi32>
      %45 = arith.cmpi sge, %13, %44 : vector<64x1xi32>
      %46 = vector.broadcast %31 : i32 to vector<64x1xi32>
      %47 = arith.cmpi slt, %13, %46 : vector<64x1xi32>
      %48 = arith.andi %45, %47 : vector<64x1xi1>
      %cst_21 = arith.constant 0xFF800000 : f32
      %49 = vector.shape_cast %48 : vector<64x1xi1> to vector<64x1xi1>
      %50 = vector.broadcast %49 : vector<64x1xi1> to vector<64x128xi1>
      %51 = vector.broadcast %cst_21 : f32 to vector<64x128xf32>
      %52 = arith.select %50, %5, %51 : vector<64x128xi1>, vector<64x128xf32>
      %cst_22 = arith.constant dense<0xFF800000> : vector<128xf32>
      %53 = vector.multi_reduction <maximumf>, %52, %cst_22 [0] : vector<64x128xf32> to vector<128xf32>
      %54 = vector.shape_cast %53 : vector<128xf32> to vector<1x128xf32>
      %c2_23 = arith.constant 2 : index
      %c0_24 = arith.constant 0 : index
      %55 = vector.load %arg8[%c2_23, %c0_24] : memref<8x128xf32, #tpu.memory_space<vmem>>, vector<1x128xf32>
      tpu.vector_store %arg8[%c2_23, %c0_24], %54 {strides = array<i32>} : memref<8x128xf32, #tpu.memory_space<vmem>>, vector<1x128xf32>,
    } else {
    }
    %c0_14 = arith.constant 0 : index
    %c0_15 = arith.constant 0 : index
    %37 = vector.load %arg7[%c0_14, %c0_15] : memref<8x128xf32, #tpu.memory_space<vmem>>, vector<8x128xf32>
    %c0_16 = arith.constant 0 : index
    %c0_17 = arith.constant 0 : index
    %38 = vector.load %arg8[%c0_16, %c0_17] : memref<8x128xf32, #tpu.memory_space<vmem>>, vector<8x128xf32>
    %39 = arith.maximumf %37, %38 : vector<8x128xf32>
    %c0_18 = arith.constant 0 : index
    %c0_19 = arith.constant 0 : index
    %40 = vector.load %arg7[%c0_18, %c0_19] : memref<8x128xf32, #tpu.memory_space<vmem>>, vector<8x128xf32>
    tpu.vector_store %arg7[%c0_18, %c0_19], %39 {strides = array<i32>} : memref<8x128xf32, #tpu.memory_space<vmem>>, vector<8x128xf32>,
    %c1_i32 = arith.constant 1 : i32
    %41 = arith.cmpi eq, %arg1, %c1_i32 : i32
    %42 = arith.extui %41 : i1 to i32
    %c0_i32_20 = arith.constant 0 : i32
    %43 = arith.cmpi ne, %42, %c0_i32_20 : i32
    scf.if %43 {
      %c0_21 = arith.constant 0 : index
      %c0_22 = arith.constant 0 : index
      %44 = vector.load %arg7[%c0_21, %c0_22] : memref<8x128xf32, #tpu.memory_space<vmem>>, vector<8x128xf32>
      %c0_23 = arith.constant 0 : index
      %c0_24 = arith.constant 0 : index
      %45 = vector.load %arg5[%c0_23, %c0_24] : memref<1x128xf32, #tpu.memory_space<vmem>>, vector<1x128xf32>
      %46 = vector.broadcast %45 : vector<1x128xf32> to vector<8x128xf32>
      %47 = arith.addf %44, %46 : vector<8x128xf32>
      %c0_25 = arith.constant 0 : index
      %c0_26 = arith.constant 0 : index
      %c0_27 = arith.constant 0 : index
      %48 = vector.load %arg6[%c0_25, %c0_26, %c0_27] : memref<1x8x128xf32, #tpu.memory_space<vmem>>, vector<1x8x128xf32>
      %49 = vector.shape_cast %48 : vector<1x8x128xf32> to vector<8x128xf32>
      %50 = vector.shape_cast %47 : vector<8x128xf32> to vector<1x8x128xf32>
      tpu.vector_store %arg6[%c0_25, %c0_26, %c0_27], %50 {strides = array<i32>} : memref<1x8x128xf32, #tpu.memory_space<vmem>>, vector<1x8x128xf32>,
    } else {
    }
    return
  }
  func.func @transform_0(%arg0: i32, %arg1: i32, %arg2: memref<4xi32, #tpu.memory_space<smem>>) -> (i32, i32) {
    %c2_i32 = arith.constant 2 : i32
    %0 = arith.muli %arg0, %c2_i32 : i32
    %1 = arith.addi %0, %arg1 : i32
    %c3_i32 = arith.constant 3 : i32
    %2 = arith.minsi %1, %c3_i32 : i32
    %c0_i32 = arith.constant 0 : i32
    %c0_i32_0 = arith.constant 0 : i32
    return %2, %c0_i32 : i32, i32
  }
  func.func @transform_1(%arg0: i32, %arg1: i32, %arg2: memref<4xi32, #tpu.memory_space<smem>>) -> (i32, i32) {
    %c0_i32 = arith.constant 0 : i32
    %c0_i32_0 = arith.constant 0 : i32
    %c0_i32_1 = arith.constant 0 : i32
    return %c0_i32, %c0_i32_0 : i32, i32
  }
  func.func @transform_2(%arg0: i32, %arg1: i32, %arg2: memref<4xi32, #tpu.memory_space<smem>>) -> (i32, i32) {
    %c0_i32 = arith.constant 0 : i32
    %c0_i32_0 = arith.constant 0 : i32
    %c0_i32_1 = arith.constant 0 : i32
    return %c0_i32, %c0_i32_0 : i32, i32
  }
  func.func @transform_3(%arg0: i32, %arg1: i32, %arg2: memref<4xi32, #tpu.memory_space<smem>>) -> (i32, i32, i32) {
    %c0_i32 = arith.constant 0 : i32
    %c0_i32_0 = arith.constant 0 : i32
    %c0_i32_1 = arith.constant 0 : i32
    return %arg0, %c0_i32, %c0_i32_0 : i32, i32, i32
  }
}

</mosaic_0001>

<bundles_post_ra>
// kernel: tpu_custom_call.1
= control target key start
LH: loop header
LB: loop body
LE: loop exit
PB: predicated region body
PF: predicated region fallthrough
CT: control target
= control target key end

     0   :  { %s1669_s0 = inlined_call_operand.vmem [shape: s32[4], index: 0, kind: input, shape index: {}]   ;;  %s1670_s1 = inlined_call_operand.vmem [shape: f32[200,32], index: 1, kind: input, shape index: {}]   ;;  %s1671_s2 = inlined_call_operand.vmem [shape: f32[128,32], index: 2, kind: input, shape index: {}]   ;;  %s1672_s3 = inlined_call_operand.vmem [shape: f32[1,128], index: 3, kind: input, shape index: {}]   ;;  %s1673_s4 = inlined_call_operand.hbm [shape: f32[2,8,128], index: 4, kind: output, shape index: {}]  }
   0x1   :  { %s9_s17 = sshll.u32 %s1669_s0, 4  ;;  %s10_s17 = int_to_ptr.vmem [resolvable:$true] %s9_s17 }
   0x2   :  { %s1043_s18 = scalar_lea.vmem %s10_s17, 16  ;;  %p1048_p1 = scmp.lt.s32.totalorder %s10_s17, %s10_s17 }
   0x3   :  { %p1044_p0 = scmp.ne.s32.totalorder %s10_s17, %s1043_s18  ;;  %p1049_p2 = scmp.lt.s32.totalorder %s1043_s18, %s1043_s18 }
   0x5   :  { %p1050_p3 = por %p1049_p2, %p1048_p1 }
   0x7   :  { %p1051_p4 = pnand %p1050_p3, %p1044_p0 }
   0x9   :  { %1054 = shalt.err (!%p1051_p4)  }
   0xa   :  { %s1153_s19 = smov [#allocation5]  }
   0xb   :  { %12 = dma.vmem_to_smem %s10_s17, 16, %s1153_s19, [#allocation4] }
   0xc   :  { %1115 = dma.done.wait [#allocation4], 16 }
   0xd   :  { %1116 = vsyncadd [#allocation4], 4294967280 }
   0xe   :  { %14 = sfence }
   0xf   :  { %15 = vsyncpa [#allocation7], 0 }
  0x10   :  { %17 = vsyncpa [#allocation7 + $0x1], 0  ;;  %s1185_s20 = smov 0   ;;  %s1187_s21 = smov 0  }
  0x11   :  { %s1189_s0 = smov 0   ;;  %s1191_s22 = smov 0  }
  0x12   :  { %s1193_s23 = smov 0   ;;  %s1195_s24 = smov 0  }
  0x13   :  { %s1197_s25 = smov 0   ;;  %s1199_s26 = smov 0  }
  0x14 LB: > { %s788_s27 = sadd.s32 4294967295, %s1151_s26   ;;  %s789_s28 = sadd.s32 4294967294, %s1151_s26   ;;  %s1151_s26 = sphi %s1199_s26, %s23_s26   ;;  %s1147_s25 = sphi %s1197_s25, %s1709_s25   ;;  %s1143_s24 = sphi %s1195_s24, %s1708_s24   ;;  %s1139_s23 = sphi %s1193_s23, %s1707_s23   ;;  %s1135_s22 = sphi %s1191_s22, %s1706_s22   ;;  %s1131_s0 = sphi %s1189_s0, %s1705_s0   ;;  %s1127_s21 = sphi %s1187_s21, %s1704_s21   ;;  %s1123_s20 = sphi %s1185_s20, %s1703_s20  }
  0x15   : > { %s32_s29 = sadd.s32 1, %s1143_s24  ;;  %s35_s30 = sadd.s32 1, %s1147_s25 }
  0x16   : > { %p33_p5 = scmp.ge.s32.totalorder %s32_s29, 2  ;;  %p128_p6 = scmp.ne.s32.totalorder %s1131_s0, %s1127_s21 }
  0x17   : > { %p129_p7 = scmp.eq.s32.totalorder %s788_s27, 3  ;;  %p134_p9 = scmp.ne.s32.totalorder %s1127_s21, %s1123_s20 }
  0x18   : > { %s1711_s29 = smov (%p33_p5, %s32_s29), 0  ;;  %s1713_s30 = smov (!%p33_p5, %s35_s30), %s1147_s25 }
  0x19   : > { %p1234_p8 = por %p129_p7, %p128_p6  ;;  %p37_p10 = scmp.ge.s32.totalorder %s1713_s30, 2 }
  0x1a   : > { %p135_p11 = scmp.eq.s32.totalorder %s789_s28, 3  ;;  %p794_p12 = scmp.ge.s32.totalorder %s1151_s26, 1 }
  0x1b   : > { %p184_p13 = scmp.lt.s32.totalorder %s1151_s26, 5  ;;  %s1715_s30 = smov (%p37_p10, %s1713_s30), 0 }
  0x1c   : > { %p1244_p0 = por %p135_p11, %p134_p9  ;;  %s115_s7 = ssub.s32 %s1147_s25, %s1715_s30 }
  0x1d   : > { %p185_p1 = pnand %p794_p12, %p184_p13  ;;  %s118_s8 = sadd.s32 1, %s1131_s0 }
  0x1e   : > { %p116_p2 = scmp.eq.s32.totalorder %s115_s7, 0  ;;  %s213_s10 = sand.u32 (!%p185_p1), 1, %s1127_s21  }
  0x1f   : > { %188 = sbr.rel (%p185_p1) target bundleno = 471 (0x1d7), region = 32  ;;  %s796_s11 = sshll.u32 (!%p185_p1), %s1139_s23, 1 }
  0x20   : > { %s1252_s9 = scalar_select %p116_p2, %s1131_s0, %s118_s8  }
  0x21   : > { %s1258_s12 = sshll.u32 (!%p185_p1), %s213_s10, 3  ;;  %s217_s13 = sadd.s32 (!%p185_p1), %s1135_s22, %s796_s11 }
  0x22   : > { %p218_p3 = scmp.lt.s32.totalorder (!%p185_p1), %s217_s13, 3  ;;  %s215_s19 = scalar_lea.vmem (!%p185_p1), [#allocation6], %s1258_s12 }
  0x23   : > { %p799_p5 = scmp.ne.s32.totalorder (!%p185_p1), %s1135_s22, 0 }
  0x26   : > { %s1717_s13 = smov (!%p218_p3, %s217_s13), 3  ;;  %241 = sbr.rel (%p799_p5) target bundleno = 45 (0x2d), region = 36 }
  0x27   : > { %s797_s14 = sshll.u32 %s1717_s13, 3  ;;  %v1154_v0 = vmov (!%p799_p5), -inf  }
  0x28   : > { %p225_p4 = scmp.lt.s32.totalorder %s797_s14, 24  ;;  %242 = vst [vmem:[#allocation2] sm:$0xff] (!%p799_p5), %v1154_v0 }
  0x2a   : > { %s1719_s14 = smov (!%p225_p4, %s797_s14), 24 }
  0x2b   : > { %s798_s15 = sshll.u32 %s1719_s14, 3 }
  0x2c   : > { %s1267_s18 = scalar_lea.vmem %s1670_s1, %s798_s15 }
  0x2d PF: > { %v251_v1 = vld [vmem:[%s1671_s2] sm:$0xff]  ;;  %v252_v2 = vld [vmem:[%s1671_s2 + $0x8] sm:$0xff]  ;;  %vm267_vm0 = vcmask 261120   ;;  %v253_v3 = vld [vmem:[%s1671_s2 + $0x10] sm:$0xff]  ;;  %s1405_s14 = sld [smem:[#allocation5]]  ;;  %s1407_s15 = sld [smem:[#allocation5 + $0x1]]  ;;  %v451_v34 = vlaneseq }
  0x2e   : > { %v905_v4 = vpack.c.bf16 %v252_v2, %v251_v1  ;;  %vm1282_vm1 = vmpackc.low %vm267_vm0, %vm267_vm0  ;;  %v254_v6 = vld [vmem:[%s1671_s2 + $0x18] sm:$0xff]  ;;  %v243_v8 = vld [vmem:[%s1267_s18] sm:$0xff]  ;;  %s1410_s16 = sshll.u32 %s1717_s13, 6  ;;  %v1155_v52 = vmov -inf  }
  0x2f   : > { %v911_v7 = vpack.c.bf16 %v254_v6, %v253_v3  ;;  %v255_v9 = vld [vmem:[%s1671_s2 + $0x20] sm:$0xff]  ;;  %v256_v10 = vld [vmem:[%s1671_s2 + $0x28] sm:$0xff]  ;;  %893 = vmatprep.mubr.msk.f32.mxu0 %vm267_vm0, %v243_v8  ;;  %v257_v13 = vld [vmem:[%s1671_s2 + $0x30] sm:$0xff]  ;;  %v452_v35 = vshrl.u32 %v451_v34, 7  ;;  %s1413_s17 = sadd.s32 64, %s1410_s16  ;;  %v460_v43 = vstv %s1410_s16  ;;  %469 = vst [vmem:[#allocation3] sm:$0xff] %v1155_v52 }
  0x30   : > { %907 = vmatprep.subr.msk.bf16.mxu0 %vm1282_vm1, %v905_v4  ;;  %953 = vmatprep.subr.msk.bf16.mxu1 %vm1282_vm1, %v905_v4  ;;  %v247_v11 = vld [vmem:[%s1267_s18 + $0x20] sm:$0xff]  ;;  %v917_v12 = vpack.c.bf16 %v256_v10, %v255_v9  ;;  %v258_v14 = vld [vmem:[%s1671_s2 + $0x38] sm:$0xff]  ;;  %v260_v17 = vld [vmem:[%s1671_s2 + $0x48] sm:$0xff] }
  0x31   : > { %910 = vmatpush3.bf16.xpose.msk.msra.mxu0 %vm1282_vm1, %v905_v4  ;;  %961 = vmatpush3.bf16.xpose.msk.msra.mxu1 %vm1282_vm1, %v905_v4  ;;  %v923_v15 = vpack.c.bf16 %v258_v14, %v257_v13  ;;  %v259_v16 = vld [vmem:[%s1671_s2 + $0x40] sm:$0xff]  ;;  %v261_v19 = vld [vmem:[%s1671_s2 + $0x50] sm:$0xff]  ;;  %v262_v20 = vld [vmem:[%s1671_s2 + $0x58] sm:$0xff]  ;;  %v453_v36 = vadd.s32 8, %v452_v35  ;;  %v454_v37 = vadd.s32 16, %v452_v35  ;;  %v455_v38 = vadd.s32 24, %v452_v35 }
  0x32   : > { %913 = vmatprep.subr.msk.bf16.mxu0 %vm1282_vm1, %v911_v7  ;;  %954 = vmatprep.subr.msk.bf16.mxu1 %vm1282_vm1, %v911_v7  ;;  %v929_v18 = vpack.c.bf16 %v260_v17, %v259_v16  ;;  %v935_v21 = vpack.c.bf16 %v262_v20, %v261_v19  ;;  %v263_v22 = vld [vmem:[%s1671_s2 + $0x60] sm:$0xff]  ;;  %v264_v23 = vld [vmem:[%s1671_s2 + $0x68] sm:$0xff]  ;;  %v265_v25 = vld [vmem:[%s1671_s2 + $0x70] sm:$0xff]  ;;  %v456_v39 = vadd.s32 32, %v452_v35  ;;  %v457_v40 = vadd.s32 40, %v452_v35 }
  0x33   : > { %899 = vmatprep.mubr.msk.f32.mxu1 %vm267_vm0, %v247_v11  ;;  %v941_v24 = vpack.c.bf16 %v264_v23, %v263_v22  ;;  %v266_v26 = vld [vmem:[%s1671_s2 + $0x78] sm:$0xff]  ;;  %v244_v28 = vld [vmem:[%s1267_s18 + $0x8] sm:$0xff]  ;;  %v245_v30 = vld [vmem:[%s1267_s18 + $0x10] sm:$0xff]  ;;  %p472_p6 = scmp.gt.s32.totalorder %s1407_s15, %s1410_s16  ;;  %p473_p7 = scmp.lt.s32.totalorder %s1405_s14, %s1413_s17  ;;  %v458_v41 = vadd.s32 48, %v452_v35  ;;  %v459_v42 = vadd.s32 56, %v452_v35  ;;  %v1420_v44 = vadd.s32 %v460_v43, %v452_v35 }
  0x34   : > { %v947_v27 = vpack.c.bf16 %v266_v26, %v265_v25  ;;  %v248_v29 = vld [vmem:[%s1267_s18 + $0x28] sm:$0xff]  ;;  %v249_v31 = vld [vmem:[%s1267_s18 + $0x30] sm:$0xff]  ;;  %v246_v32 = vld [vmem:[%s1267_s18 + $0x18] sm:$0xff]  ;;  %v1422_v45 = vadd.s32 %v460_v43, %v453_v36  ;;  %v1424_v46 = vadd.s32 %v460_v43, %v454_v37  ;;  %v1426_v47 = vadd.s32 %v460_v43, %v455_v38 }
  0x35   : > { %v250_v33 = vld [vmem:[%s1267_s18 + $0x38] sm:$0xff]  ;;  %p1428_p9 = pnand %p473_p7, %p472_p6  ;;  %v1432_v48 = vadd.s32 %v460_v43, %v456_v39  ;;  %v1434_v49 = vadd.s32 %v460_v43, %v457_v40  ;;  %v1436_v50 = vadd.s32 %v460_v43, %v458_v41  ;;  %v1438_v51 = vadd.s32 %v460_v43, %v459_v42 }
  0x36   : > { %v478_v61 = vstv (!%p1428_p9), %s1405_s14  ;;  %v487_v62 = vstv (!%p1428_p9), %s1407_s15 }
  0x37   : > { %vm479_vm2 = vcmp.ge.s32.totalorder (!%p1428_p9), %v1420_v44, %v478_v61  ;;  %vm480_vm3 = vcmp.ge.s32.totalorder (!%p1428_p9), %v1422_v45, %v478_v61  ;;  %vm481_vm4 = vcmp.ge.s32.totalorder (!%p1428_p9), %v1424_v46, %v478_v61  ;;  %vm488_vm5 = vcmp.lt.s32.totalorder (!%p1428_p9), %v1420_v44, %v487_v62 }
  0x38   : > { %vm489_vm6 = vcmp.lt.s32.totalorder (!%p1428_p9), %v1422_v45, %v487_v62  ;;  %vm490_vm7 = vcmp.lt.s32.totalorder (!%p1428_p9), %v1424_v46, %v487_v62  ;;  %vm482_vm8 = vcmp.ge.s32.totalorder (!%p1428_p9), %v1426_v47, %v478_v61  ;;  %vm491_vm9 = vcmp.lt.s32.totalorder (!%p1428_p9), %v1426_v47, %v487_v62  ;;  %vm1468_vm10 = vmand (!%p1428_p9), %vm479_vm2, %vm488_vm5 }
  0x39   : > { %916 = vmatpush3.bf16.xpose.msk.msra.mxu0 %vm1282_vm1, %v911_v7  ;;  %962 = vmatpush3.bf16.xpose.msk.msra.mxu1 %vm1282_vm1, %v911_v7  ;;  %vm483_vm11 = vcmp.ge.s32.totalorder (!%p1428_p9), %v1432_v48, %v478_v61  ;;  %vm492_vm12 = vcmp.lt.s32.totalorder (!%p1428_p9), %v1432_v48, %v487_v62  ;;  %vm1474_vm13 = vmand (!%p1428_p9), %vm480_vm3, %vm489_vm6  ;;  %vm484_vm14 = vcmp.ge.s32.totalorder (!%p1428_p9), %v1434_v49, %v478_v61 }
  0x3a   : > { %919 = vmatprep.subr.msk.bf16.mxu0 %vm1282_vm1, %v917_v12  ;;  %955 = vmatprep.subr.msk.bf16.mxu1 %vm1282_vm1, %v917_v12  ;;  %vm493_vm15 = vcmp.lt.s32.totalorder (!%p1428_p9), %v1434_v49, %v487_v62  ;;  %vm494_vm2 = vcmp.lt.s32.totalorder (!%p1428_p9), %v1436_v50, %v487_v62  ;;  %vm1486_vm5 = vmand (!%p1428_p9), %vm482_vm8, %vm491_vm9  ;;  %vm486_vm3 = vcmp.ge.s32.totalorder (!%p1428_p9), %v1438_v51, %v478_v61 }
  0x3b   : > { %vm495_vm6 = vcmp.lt.s32.totalorder (!%p1428_p9), %v1438_v51, %v487_v62 }
  0x3c   : > { %vm503_vm9 = vmand (!%p1428_p9), %vm486_vm3, %vm495_vm6 }
  0x41   : > { %922 = vmatpush3.bf16.xpose.msk.msra.mxu0 %vm1282_vm1, %v917_v12  ;;  %963 = vmatpush3.bf16.xpose.msk.msra.mxu1 %vm1282_vm1, %v917_v12 }
  0x42   : > { %925 = vmatprep.subr.msk.bf16.mxu0 %vm1282_vm1, %v923_v15  ;;  %956 = vmatprep.subr.msk.bf16.mxu1 %vm1282_vm1, %v923_v15 }
  0x49   : > { %928 = vmatpush3.bf16.xpose.msk.msra.mxu0 %vm1282_vm1, %v923_v15  ;;  %964 = vmatpush3.bf16.xpose.msk.msra.mxu1 %vm1282_vm1, %v923_v15 }
  0x4a   : > { %931 = vmatprep.subr.msk.bf16.mxu0 %vm1282_vm1, %v929_v18  ;;  %957 = vmatprep.subr.msk.bf16.mxu1 %vm1282_vm1, %v929_v18 }
  0x51   : > { %934 = vmatpush3.bf16.xpose.msk.msra.mxu0 %vm1282_vm1, %v929_v18  ;;  %965 = vmatpush3.bf16.xpose.msk.msra.mxu1 %vm1282_vm1, %v929_v18 }
  0x52   : > { %937 = vmatprep.subr.msk.bf16.mxu0 %vm1282_vm1, %v935_v21  ;;  %958 = vmatprep.subr.msk.bf16.mxu1 %vm1282_vm1, %v935_v21 }
  0x59   : > { %940 = vmatpush3.bf16.xpose.msk.msra.mxu0 %vm1282_vm1, %v935_v21  ;;  %966 = vmatpush3.bf16.xpose.msk.msra.mxu1 %vm1282_vm1, %v935_v21 }
  0x5a   : > { %943 = vmatprep.subr.msk.bf16.mxu0 %vm1282_vm1, %v941_v24  ;;  %959 = vmatprep.subr.msk.bf16.mxu1 %vm1282_vm1, %v941_v24 }
  0x61   : > { %946 = vmatpush3.bf16.xpose.msk.msra.mxu0 %vm1282_vm1, %v941_v24  ;;  %967 = vmatpush3.bf16.xpose.msk.msra.mxu1 %vm1282_vm1, %v941_v24 }
  0x62   : > { %949 = vmatprep.subr.msk.bf16.mxu0 %vm1282_vm1, %v947_v27  ;;  %960 = vmatprep.subr.msk.bf16.mxu1 %vm1282_vm1, %v947_v27 }
  0x69   : > { %952 = vmatpush3.bf16.xpose.msk.msra.mxu0 %vm1282_vm1, %v947_v27  ;;  %968 = vmatpush3.bf16.xpose.msk.msra.mxu1 %vm1282_vm1, %v947_v27  ;;  %vm485_vm1 = vcmp.ge.s32.totalorder (!%p1428_p9), %v1436_v50, %v478_v61 }
  0x6a   : > { %vm502_vm8 = vmand (!%p1428_p9), %vm485_vm1, %vm494_vm2 }
  0x70   : > { %894 = vmatmul.mubr.msk.f32.vlgmr.msra.gmra.mrb[0].mxu0 %vm267_vm0, %v244_v28  ;;  %900 = vmatmul.mubr.msk.f32.vlgmr.msra.gmra.mrb[0].mxu1 %vm267_vm0, %v248_v29 }
  0x71   : > { %896 = vmatprep.mubr.msk.f32.mxu0 %vm267_vm0, %v245_v30  ;;  %902 = vmatprep.mubr.msk.f32.mxu1 %vm267_vm0, %v249_v31 }
  0x74   : > { %897 = vmatmul.mubr.msk.f32.gmra.mrb[2].mxu0 %vm267_vm0, %v246_v32  ;;  %903 = vmatmul.mubr.msk.f32.gmra.mrb[2].mxu1 %vm267_vm0, %v250_v33  ;;  %vm1480_vm0 = vmand (!%p1428_p9), %vm481_vm4, %vm490_vm7 }
  0x75   : > { %vm500_vm4 = vmand (!%p1428_p9), %vm483_vm11, %vm492_vm12 }
  0x76   : > { %vm501_vm7 = vmand (!%p1428_p9), %vm484_vm14, %vm493_vm15 }
 0x142   : > { %477 = sbr.rel (%p1428_p9) target bundleno = 349 (0x15d), region = 40 }
 0x143   : > { %v1440_v53 = vpop.f32.mrb[0].mxu0  ;;  %v1442_v54 = vpop.f32.mrb[0].mxu1 }
 0x144   : > { %v1444_v55 = vpop.f32.mrb[1].mxu0  ;;  %v1446_v56 = vpop.f32.mrb[1].mxu1  ;;  %v521_v4 = vsel (!%p1428_p9), %vm1474_vm13, %v1440_v53, -inf  ;;  %v525_v8 = vsel (!%p1428_p9), %vm501_vm7, %v1442_v54, -inf }
 0x145   : > { %v520_v3 = vsel (!%p1428_p9), %vm1468_vm10, %v1444_v55, -inf  ;;  %v524_v6 = vsel (!%p1428_p9), %vm500_vm4, %v1446_v56, -inf  ;;  %v529_v11 = vmax.f32 (!%p1428_p9), %v521_v4, %v525_v8 }
 0x146   : > { %v528_v9 = vmax.f32 (!%p1428_p9), %v520_v3, %v524_v6 }
 0x147   : > { %v1448_v57 = vpop.f32.mrb[2].mxu0  ;;  %v1450_v58 = vpop.f32.mrb[2].mxu1 }
 0x148   : > { %v1452_v59 = vpop.f32.mrb[3].mxu0  ;;  %v1454_v60 = vpop.f32.mrb[3].mxu1  ;;  %v523_v7 = vsel (!%p1428_p9), %vm1486_vm5, %v1448_v57, -inf  ;;  %v527_v12 = vsel (!%p1428_p9), %vm503_vm9, %v1450_v58, -inf  ;;  %v532_v15 = vmax.f32 (!%p1428_p9), %v528_v9, %v529_v11 }
 0x149   : > { %v522_v5 = vsel %vm1480_vm0, %v1452_v59, -inf  ;;  %v526_v10 = vsel %vm502_vm8, %v1454_v60, -inf  ;;  %v531_v14 = vmax.f32 %v523_v7, %v527_v12 }
 0x14a   : > { %v530_v13 = vmax.f32 %v522_v5, %v526_v10 }
 0x14c   : > { %v533_v16 = vmax.f32 %v530_v13, %v531_v14 }
 0x14e   : > { %v534_v17 = vmax.f32 %v532_v15, %v533_v16 }
 0x150   : > { %v535_v18 = vrot.slane %v534_v17, 4 }
 0x152   : > { %v536_v19 = vmax.f32 %v534_v17, %v535_v18 }
 0x154   : > { %v537_v20 = vrot.slane %v536_v19, 2 }
 0x156   : > { %v538_v21 = vmax.f32 %v536_v19, %v537_v20 }
 0x158   : > { %v539_v22 = vrot.slane %v538_v21, 1 }
 0x15a   : > { %v540_v23 = vmax.f32 %v538_v21, %v539_v22 }
 0x15c   : > { %541 = vst [vmem:[#allocation3] sm:$0x1] %v540_v23 }
 0x15d PF: > { %s827_s18 = sld [smem:[#allocation5 + $0x1]]  ;;  %s828_s27 = sld [smem:[#allocation5 + $0x2]] }
 0x163   : > { %p544_p10 = scmp.gt.s32.totalorder %s828_s27, %s1410_s16  ;;  %p545_p11 = scmp.lt.s32.totalorder %s827_s18, %s1413_s17 }
 0x165   : > { %p546_p12 = pnand %p545_p11, %p544_p10 }
 0x166   : > { %v550_v24 = vstv (!%p546_p12), %s827_s18  ;;  %v559_v25 = vstv (!%p546_p12), %s828_s27 }
 0x167   : > { %549 = sbr.rel (%p546_p12) target bundleno = 388 (0x184), region = 44  ;;  %vm551_vm10 = vcmp.ge.s32.totalorder (!%p546_p12), %v1420_v44, %v550_v24  ;;  %vm552_vm11 = vcmp.ge.s32.totalorder (!%p546_p12), %v1422_v45, %v550_v24  ;;  %vm553_vm12 = vcmp.ge.s32.totalorder (!%p546_p12), %v1424_v46, %v550_v24  ;;  %vm560_vm13 = vcmp.lt.s32.totalorder (!%p546_p12), %v1420_v44, %v559_v25 }
 0x168   : > { %vm561_vm14 = vcmp.lt.s32.totalorder (!%p546_p12), %v1422_v45, %v559_v25  ;;  %vm562_vm15 = vcmp.lt.s32.totalorder (!%p546_p12), %v1424_v46, %v559_v25  ;;  %vm554_vm0 = vcmp.ge.s32.totalorder (!%p546_p12), %v1426_v47, %v550_v24  ;;  %vm563_vm1 = vcmp.lt.s32.totalorder (!%p546_p12), %v1426_v47, %v559_v25  ;;  %vm1518_vm2 = vmand (!%p546_p12), %vm551_vm10, %vm560_vm13 }
 0x169   : > { %vm555_vm5 = vcmp.ge.s32.totalorder (!%p546_p12), %v1432_v48, %v550_v24  ;;  %vm564_vm3 = vcmp.lt.s32.totalorder (!%p546_p12), %v1432_v48, %v559_v25  ;;  %vm1524_vm6 = vmand (!%p546_p12), %vm552_vm11, %vm561_vm14  ;;  %vm556_vm4 = vcmp.ge.s32.totalorder (!%p546_p12), %v1434_v49, %v550_v24  ;;  %vm565_vm7 = vcmp.lt.s32.totalorder (!%p546_p12), %v1434_v49, %v559_v25 }
 0x16a   : > { %vm1530_vm8 = vmand (!%p546_p12), %vm553_vm12, %vm562_vm15  ;;  %vm557_vm9 = vcmp.ge.s32.totalorder (!%p546_p12), %v1436_v50, %v550_v24  ;;  %vm566_vm10 = vcmp.lt.s32.totalorder (!%p546_p12), %v1436_v50, %v559_v25  ;;  %v592_v30 = vsel (!%p546_p12), %vm1518_vm2, %v1444_v55, -inf  ;;  %vm558_vm11 = vcmp.ge.s32.totalorder (!%p546_p12), %v1438_v51, %v550_v24 }
 0x16b   : > { %vm1536_vm13 = vmand (!%p546_p12), %vm554_vm0, %vm563_vm1  ;;  %vm567_vm14 = vcmp.lt.s32.totalorder (!%p546_p12), %v1438_v51, %v559_v25  ;;  %v593_v31 = vsel (!%p546_p12), %vm1524_vm6, %v1440_v53, -inf  ;;  %v594_v32 = vsel (!%p546_p12), %vm1530_vm8, %v1452_v59, -inf }
 0x16c   : > { %vm572_vm12 = vmand (!%p546_p12), %vm555_vm5, %vm564_vm3  ;;  %v595_v34 = vsel (!%p546_p12), %vm1536_vm13, %v1448_v57, -inf }
 0x16d   : > { %vm573_vm15 = vmand (!%p546_p12), %vm556_vm4, %vm565_vm7  ;;  %v596_v33 = vsel (!%p546_p12), %vm572_vm12, %v1446_v56, -inf }
 0x16e   : > { %vm574_vm0 = vmand %vm557_vm9, %vm566_vm10  ;;  %v597_v35 = vsel %vm573_vm15, %v1442_v54, -inf  ;;  %v600_v36 = vmax.f32 %v592_v30, %v596_v33 }
 0x16f   : > { %vm575_vm1 = vmand %vm558_vm11, %vm567_vm14  ;;  %v598_v37 = vsel %vm574_vm0, %v1454_v60, -inf  ;;  %v601_v38 = vmax.f32 %v593_v31, %v597_v35 }
 0x170   : > { %v599_v39 = vsel %vm575_vm1, %v1450_v58, -inf  ;;  %v602_v40 = vmax.f32 %v594_v32, %v598_v37 }
 0x171   : > { %v603_v41 = vmax.f32 %v595_v34, %v599_v39  ;;  %v604_v42 = vmax.f32 %v600_v36, %v601_v38 }
 0x173   : > { %v605_v43 = vmax.f32 %v602_v40, %v603_v41 }
 0x175   : > { %v606_v52 = vmax.f32 %v604_v42, %v605_v43 }
 0x177   : > { %v607_v61 = vrot.slane %v606_v52, 4 }
 0x179   : > { %v608_v62 = vmax.f32 %v606_v52, %v607_v61 }
 0x17b   : > { %v609_v63 = vrot.slane %v608_v62, 2 }
 0x17d   : > { %v610_v0 = vmax.f32 %v608_v62, %v609_v63 }
 0x17f   : > { %v611_v1 = vrot.slane %v610_v0, 1 }
 0x181   : > { %v612_v2 = vmax.f32 %v610_v0, %v611_v1 }
 0x183   : > { %613 = vst [vmem:[#allocation3 + $0x1] sm:$0x1] %v612_v2 }
 0x184 PF: > { %s829_s28 = sld [smem:[#allocation5 + $0x2]]  ;;  %s830_s7 = sld [smem:[#allocation5 + $0x3]] }
 0x18a   : > { %p616_p13 = scmp.gt.s32.totalorder %s830_s7, %s1410_s16  ;;  %p617_p1 = scmp.lt.s32.totalorder %s829_s28, %s1413_s17 }
 0x18c   : > { %p618_p2 = pnand %p617_p1, %p616_p13 }
 0x18d   : > { %v622_v3 = vstv (!%p618_p2), %s829_s28  ;;  %v631_v4 = vstv (!%p618_p2), %s830_s7 }
 0x18e   : > { %621 = sbr.rel (%p618_p2) target bundleno = 427 (0x1ab), region = 48  ;;  %vm623_vm2 = vcmp.ge.s32.totalorder (!%p618_p2), %v1420_v44, %v622_v3  ;;  %vm624_vm5 = vcmp.ge.s32.totalorder (!%p618_p2), %v1422_v45, %v622_v3  ;;  %vm625_vm3 = vcmp.ge.s32.totalorder (!%p618_p2), %v1424_v46, %v622_v3  ;;  %vm632_vm6 = vcmp.lt.s32.totalorder (!%p618_p2), %v1420_v44, %v631_v4 }
 0x18f   : > { %vm633_vm4 = vcmp.lt.s32.totalorder (!%p618_p2), %v1422_v45, %v631_v4  ;;  %vm634_vm7 = vcmp.lt.s32.totalorder (!%p618_p2), %v1424_v46, %v631_v4  ;;  %vm626_vm8 = vcmp.ge.s32.totalorder (!%p618_p2), %v1426_v47, %v622_v3  ;;  %vm635_vm9 = vcmp.lt.s32.totalorder (!%p618_p2), %v1426_v47, %v631_v4  ;;  %vm1568_vm10 = vmand (!%p618_p2), %vm623_vm2, %vm632_vm6 }
 0x190   : > { %vm627_vm13 = vcmp.ge.s32.totalorder (!%p618_p2), %v1432_v48, %v622_v3  ;;  %vm636_vm11 = vcmp.lt.s32.totalorder (!%p618_p2), %v1432_v48, %v631_v4  ;;  %vm1574_vm14 = vmand (!%p618_p2), %vm624_vm5, %vm633_vm4  ;;  %vm628_vm12 = vcmp.ge.s32.totalorder (!%p618_p2), %v1434_v49, %v622_v3  ;;  %vm637_vm15 = vcmp.lt.s32.totalorder (!%p618_p2), %v1434_v49, %v631_v4 }
 0x191   : > { %vm1580_vm0 = vmand (!%p618_p2), %vm625_vm3, %vm634_vm7  ;;  %vm629_vm1 = vcmp.ge.s32.totalorder (!%p618_p2), %v1436_v50, %v622_v3  ;;  %vm638_vm2 = vcmp.lt.s32.totalorder (!%p618_p2), %v1436_v50, %v631_v4  ;;  %v664_v46 = vsel (!%p618_p2), %vm1568_vm10, %v1444_v55, -inf  ;;  %vm630_vm5 = vcmp.ge.s32.totalorder (!%p618_p2), %v1438_v51, %v622_v3 }
 0x192   : > { %vm1586_vm6 = vmand (!%p618_p2), %vm626_vm8, %vm635_vm9  ;;  %vm639_vm4 = vcmp.lt.s32.totalorder (!%p618_p2), %v1438_v51, %v631_v4  ;;  %v665_v47 = vsel (!%p618_p2), %vm1574_vm14, %v1440_v53, -inf  ;;  %v666_v48 = vsel (!%p618_p2), %vm1580_vm0, %v1452_v59, -inf }
 0x193   : > { %vm644_vm3 = vmand (!%p618_p2), %vm627_vm13, %vm636_vm11  ;;  %v667_v50 = vsel (!%p618_p2), %vm1586_vm6, %v1448_v57, -inf }
 0x194   : > { %vm645_vm7 = vmand (!%p618_p2), %vm628_vm12, %vm637_vm15  ;;  %v668_v49 = vsel (!%p618_p2), %vm644_vm3, %v1446_v56, -inf }
 0x195   : > { %vm646_vm8 = vmand %vm629_vm1, %vm638_vm2  ;;  %v669_v55 = vsel %vm645_vm7, %v1442_v54, -inf  ;;  %v672_v51 = vmax.f32 %v664_v46, %v668_v49 }
 0x196   : > { %vm647_vm9 = vmand %vm630_vm5, %vm639_vm4  ;;  %v670_v7 = vsel %vm646_vm8, %v1454_v60, -inf  ;;  %v673_v8 = vmax.f32 %v665_v47, %v669_v55 }
 0x197   : > { %v671_v53 = vsel %vm647_vm9, %v1450_v58, -inf  ;;  %v674_v9 = vmax.f32 %v666_v48, %v670_v7 }
 0x198   : > { %v675_v10 = vmax.f32 %v667_v50, %v671_v53  ;;  %v676_v11 = vmax.f32 %v672_v51, %v673_v8 }
 0x19a   : > { %v677_v59 = vmax.f32 %v674_v9, %v675_v10 }
 0x19c   : > { %v678_v12 = vmax.f32 %v676_v11, %v677_v59 }
 0x19e   : > { %v679_v56 = vrot.slane %v678_v12, 4 }
 0x1a0   : > { %v680_v13 = vmax.f32 %v678_v12, %v679_v56 }
 0x1a2   : > { %v681_v14 = vrot.slane %v680_v13, 2 }
 0x1a4   : > { %v682_v15 = vmax.f32 %v680_v13, %v681_v14 }
 0x1a6   : > { %v683_v16 = vrot.slane %v682_v15, 1 }
 0x1a8   : > { %v684_v57 = vmax.f32 %v682_v15, %v683_v16 }
 0x1aa   : > { %685 = vst [vmem:[#allocation3 + $0x2] sm:$0x1] %v684_v57 }
 0x1ab PF: > { %v686_v54 = vld [vmem:[#allocation2] sm:$0xff]  ;;  %p831_p3 = scmp.ne.s32.totalorder %s1135_s22, 1 }
 0x1ac   : > { %v832_v60 = vld [vmem:[%s1672_s3] ss:$0 sm:$0xff] (!%p831_p3) }
 0x1ae   : > { %693 = sbr.rel (%p831_p3) target bundleno = 447 (0x1bf), region = 52 }
 0x1b1   : > { %v687_v17 = vld [vmem:[#allocation3] sm:$0xff] }
 0x1b2   : > { %v688_v18 = vmax.f32 %v686_v54, %v687_v17 }
 0x1b4   : > { %689 = vst [vmem:[#allocation2] sm:$0xff] %v688_v18 }
 0x1bb   : > { %v694_v58 = vld [vmem:[#allocation2] sm:$0xff] }
 0x1bc   : > { %v702_v19 = vadd.f32 %v832_v60, %v694_v58 }
 0x1be   : > { %703 = vst [vmem:[%s215_s19] sm:$0xff] %v702_v19 }
 0x1bf PF: > { %s834_s14 = sshll.u32 %s1139_s23, 7  ;;  %s718_s17 = sshll.u32 %s215_s19, 4  ;;  %s719_s17 = int_to_ptr.vmem [resolvable:$true] %s718_s17 }
 0x1c0   : > { %s1618_s22 = scalar_lea.hbm %s1673_s4, %s834_s14  ;;  %s705_s13 = scalar_lea.sflag [#allocation7], %s213_s10 }
 0x1c1   : > { %s1055_s18 = scalar_lea.vmem %s719_s17, 128  ;;  %s1156_s27 = smov [#allocation6]  }
 0x1c2   : > { %p1056_p4 = scmp.ne.s32.totalorder %s719_s17, %s1055_s18  ;;  %s1059_s28 = sshll.u32 %s1156_s27, 4  ;;  %s1060_s28 = int_to_ptr.vmem [resolvable:$false] %s1059_s28 }
 0x1c3   : > { %s1061_s7 = scalar_lea.vmem %s1060_s28, 256  ;;  %p1062_p7 = scmp.lt.s32.totalorder %s719_s17, %s1060_s28 }
 0x1c4   : > { %p1057_p5 = pnand %p1056_p4, %p1234_p8  ;;  %p1063_p9 = scmp.lt.s32.totalorder %s1061_s7, %s1055_s18 }
 0x1c6   : > { %p1058_p6 = pneg %p1057_p5  ;;  %p1064_p10 = por %p1063_p9, %p1062_p7 }
 0x1c8   : > { %p1065_p11 = pnand %p1064_p10, %p1058_p6 }
 0x1ca   : > { %1068 = shalt.err (!%p1065_p11)
}
 0x1cb   : > { %s1069_s23 = scalar_lea.hbm %s1618_s22, 128  ;;  %s1073_s19 = scalar_lea.hbm %s1673_s4, 256 }
 0x1cc   : > { %p1070_p12 = scmp.ne.s32.totalorder %s1618_s22, %s1069_s23  ;;  %p1074_p2 = scmp.lt.u32.totalorder %s1618_s22, %s1673_s4 }
 0x1cd   : > { %p1075_p3 = scmp.lt.u32.totalorder %s1073_s19, %s1069_s23  ;;  %p1077_p5 = scmp.lt.u32.totalorder %s1069_s23, %s1618_s22 }
 0x1ce   : > { %p1071_p13 = pnand %p1070_p12, %p1234_p8 }
 0x1cf   : > { %p1076_p4 = por %p1075_p3, %p1074_p2 }
 0x1d0   : > { %p1072_p1 = pneg %p1071_p13 }
 0x1d1   : > { %p1078_p6 = por %p1077_p5, %p1076_p4 }
 0x1d3   : > { %p1079_p7 = pnand %p1078_p6, %p1072_p1 }
 0x1d5   : > { %1082 = shalt.err (!%p1079_p7)
}
 0x1d6   : > { %969 = dma.vmem_to_hbm [thread:$0]  (%p1234_p8), %s719_s17, 128, %s1618_s22, %s705_s13  }
 0x1d7 PF: > { %p975_p9 = scmp.ge.s32.totalorder %s1151_s26, 2  ;;  %s730_s14 = sand.u32 1, %s1123_s20  }
 0x1d8   : > { %s731_s15 = scalar_lea.sflag [#allocation7], %s730_s14 }
 0x1d9   : > { %p972_p10 = pnand %p975_p9, %p1244_p0 }
 0x1db   : > { %1118 = dma.done.wait (!%p972_p10), %s731_s15, 128  }
 0x1dc   : > { %1120 = vsyncadd (!%p972_p10), %s731_s15, 4294967168  ;;  %s23_s26 = sadd.s32 1, %s1151_s26   ;;  %s1703_s20 = smov %s1127_s21 }
 0x1dd   : > { %p20_p11 = scmp.ge.s32.totalorder %s23_s26, 6   ;;  %s1704_s21 = smov %s1131_s0 }
 0x1de   : > { %s1705_s0 = smov %s1252_s9  ;;  %s1706_s22 = smov %s1143_s24 }
 0x1df   : > { %s1707_s23 = smov %s1147_s25  ;;  %s1708_s24 = smov %s1711_s29 }
 0x1e0   : > { %s1709_s25 = smov %s1715_s30  ;;  %22 = sbr.rel (!%p20_p11) target bundleno = 20 (0x14), region = 87 }
 0x1e7   :  { %736 = vsyncpa [#allocation7], 1 }
 0x1e8   :  { %738 = vsyncpa [#allocation7 + $0x1], 1 }

</bundles_post_ra>
